<compile_context>
chip_gen: v6e
topology: v6e:2x2x1
jax: 0.10.0
libtpu: 0.0.40
codegen_flags: <defaults>
</compile_context>

<pallas_src>
import functools

import jax
import jax.numpy as jnp
from jax.experimental import pallas as pl
from jax.experimental.pallas import tpu as pltpu


# ----------------------------- small helpers --------------------------------

def _full_spec(shape):
    nd = len(shape)
    return pl.BlockSpec(shape, lambda i, _nd=nd: (0,) * _nd)


def _row(v):
    return v.reshape(1, -1)


def _layernorm(x, g, b, eps=1e-5):
    mu = jnp.mean(x, axis=-1, keepdims=True)
    var = jnp.mean(jnp.square(x - mu), axis=-1, keepdims=True)
    return (x - mu) * jax.lax.rsqrt(var + eps) * g + b


def _silu(x):
    return x * jax.nn.sigmoid(x)


_ARB1 = pltpu.CompilerParams(dimension_semantics=("arbitrary",))


# ------------------------------ MLP kernel ----------------------------------
# Fused: Linear -> LayerNorm -> SiLU -> Linear -> LayerNorm -> SiLU

def _mlp_kernel(x_ref, w1_ref, b1_ref, g1_ref, be1_ref,
                w2_ref, b2_ref, g2_ref, be2_ref, o_ref):
    B, L, din = x_ref.shape
    dout = o_ref.shape[-1]
    x = x_ref[...].astype(jnp.float32).reshape(B * L, din)
    h = jnp.dot(x, w1_ref[...], preferred_element_type=jnp.float32) + b1_ref[...]
    h = _silu(_layernorm(h, g1_ref[...], be1_ref[...]))
    y = jnp.dot(h, w2_ref[...], preferred_element_type=jnp.float32) + b2_ref[...]
    y = _silu(_layernorm(y, g2_ref[...], be2_ref[...]))
    o_ref[...] = y.reshape(B, L, dout).astype(o_ref.dtype)


def mlp_forward(p, x):
    """x: (B, L, din) -> (B, L, dout). Whole MLP in one pallas_call."""
    B, L, _ = x.shape
    dout = p["l2"]["w"].shape[1]
    args = [x,
            p["l1"]["w"], _row(p["l1"]["b"]), _row(p["ln1"]["g"]), _row(p["ln1"]["b"]),
            p["l2"]["w"], _row(p["l2"]["b"]), _row(p["ln2"]["g"]), _row(p["ln2"]["b"])]
    return pl.pallas_call(
        _mlp_kernel,
        out_shape=jax.ShapeDtypeStruct((B, L, dout), jnp.float32),
        grid=(1,),
        in_specs=[_full_spec(a.shape) for a in args],
        out_specs=_full_spec((B, L, dout)),
        compiler_params=_ARB1,
    )(*args)


# ------------------------- fused transformer kernel -------------------------
# One pallas_call = the full nn.Transformer forward (post-norm, ReLU FFN, no masks,
# dropout=0): encoder layers -> encoder LN -> decoder layers -> decoder LN.
#
# Per-layer param layout (flattened refs):
#   encoder layer (12): wqkv, bqkv, wo, bo, ln1_g, ln1_b, wf1, bf1, wf2, bf2, ln2_g, ln2_b
#   decoder layer (20): sa_wqkv, sa_bqkv, sa_wo, sa_bo, ln1_g, ln1_b,
#                       ca_wq, ca_bq, ca_wkv, ca_bkv, ca_wo, ca_bo, ln2_g, ln2_b,
#                       wf1, bf1, wf2, bf2, ln3_g, ln3_b

def _transformer_kernel(*refs, B, S, Lt, d, nhead, n_enc, n_dec, eps=1e-5):
    dh = d // nhead
    scale = 1.0 / (dh ** 0.5)

    refs = list(refs)
    pos = [0]

    def take(n):
        out = refs[pos[0]:pos[0] + n]
        pos[0] += n
        return out

    src_ref, tgt_ref = take(2)
    enc_layers = [take(12) for _ in range(n_enc)]
    enc_ng, enc_nb = take(2)
    dec_layers = [take(20) for _ in range(n_dec)]
    dec_ng, dec_nb = take(2)
    (out_ref,) = take(1)

    def softmax(s):
        m = jnp.max(s, axis=-1, keepdims=True)
        p = jnp.exp(s - m)
        return p / jnp.sum(p, axis=-1, keepdims=True)

    def mha(q2, k2, v2, Lq, Lk, wo_ref, bo_ref):
        # q2: (B*Lq, d), k2/v2: (B*Lk, d). Head loop unrolled (nhead small); the
        # output projection is folded per head so no concat/transpose is needed.
        wo = wo_ref[...]
        acc = None
        for h in range(nhead):
            sl = slice(h * dh, (h + 1) * dh)
            qh = q2[:, sl].reshape(B, Lq, dh)
            kh = k2[:, sl].reshape(B, Lk, dh)
            vh = v2[:, sl].reshape(B, Lk, dh)
            s = jnp.einsum("bqd,bkd->bqk", qh, kh,
                           preferred_element_type=jnp.float32) * scale
            p = softmax(s)
            oh = jnp.einsum("bqk,bkd->bqd", p, vh,
                            preferred_element_type=jnp.float32)
            contrib = jnp.dot(oh.reshape(B * Lq, dh), wo[sl, :],
                              preferred_element_type=jnp.float32)
            acc = contrib if acc is None else acc + contrib
        return acc + bo_ref[...]

    def enc_layer(x2, prm):
        (wqkv, bqkv, wo, bo, g1, b1, wf1, bf1, wf2, bf2, g2, b2) = prm
        qkv = jnp.dot(x2, wqkv[...], preferred_element_type=jnp.float32) + bqkv[...]
        a = mha(qkv[:, :d], qkv[:, d:2 * d], qkv[:, 2 * d:], S, S, wo, bo)
        x2 = _layernorm(x2 + a, g1[...], b1[...], eps)
        hm = jnp.maximum(
            jnp.dot(x2, wf1[...], preferred_element_type=jnp.float32) + bf1[...], 0.0)
        ff = jnp.dot(hm, wf2[...], preferred_element_type=jnp.float32) + bf2[...]
        return _layernorm(x2 + ff, g2[...], b2[...], eps)

    def dec_layer(x2, m2, prm):
        (sqkv, sbqkv, swo, sbo, g1, b1,
         cwq, cbq, cwkv, cbkv, cwo, cbo, g2, b2,
         wf1, bf1, wf2, bf2, g3, b3) = prm
        qkv = jnp.dot(x2, sqkv[...], preferred_element_type=jnp.float32) + sbqkv[...]
        a = mha(qkv[:, :d], qkv[:, d:2 * d], qkv[:, 2 * d:], Lt, Lt, swo, sbo)
        x2 = _layernorm(x2 + a, g1[...], b1[...], eps)
        q2 = jnp.dot(x2, cwq[...], preferred_element_type=jnp.float32) + cbq[...]
        kv = jnp.dot(m2, cwkv[...], preferred_element_type=jnp.float32) + cbkv[...]
        a = mha(q2, kv[:, :d], kv[:, d:], Lt, S, cwo, cbo)
        x2 = _layernorm(x2 + a, g2[...], b2[...], eps)
        hm = jnp.maximum(
            jnp.dot(x2, wf1[...], preferred_element_type=jnp.float32) + bf1[...], 0.0)
        ff = jnp.dot(hm, wf2[...], preferred_element_type=jnp.float32) + bf2[...]
        return _layernorm(x2 + ff, g3[...], b3[...], eps)

    mem2 = src_ref[...].astype(jnp.float32).reshape(B * S, d)
    for prm in enc_layers:
        mem2 = enc_layer(mem2, prm)
    mem2 = _layernorm(mem2, enc_ng[...], enc_nb[...], eps)

    y2 = tgt_ref[...].astype(jnp.float32).reshape(B * Lt, d)
    for prm in dec_layers:
        y2 = dec_layer(y2, mem2, prm)
    y2 = _layernorm(y2, dec_ng[...], dec_nb[...], eps)

    out_ref[...] = y2.reshape(B, Lt, d).astype(out_ref.dtype)


def _enc_layer_args(lp):
    a = lp["attn"]
    return [a["wqkv"], _row(a["bqkv"]), a["wo"], _row(a["bo"]),
            _row(lp["ln1"]["g"]), _row(lp["ln1"]["b"]),
            lp["lin1"]["w"], _row(lp["lin1"]["b"]),
            lp["lin2"]["w"], _row(lp["lin2"]["b"]),
            _row(lp["ln2"]["g"]), _row(lp["ln2"]["b"])]


def _dec_layer_args(lp):
    sa, ca = lp["self_attn"], lp["cross_attn"]
    return [sa["wqkv"], _row(sa["bqkv"]), sa["wo"], _row(sa["bo"]),
            _row(lp["ln1"]["g"]), _row(lp["ln1"]["b"]),
            ca["wq"], _row(ca["bq"]), ca["wkv"], _row(ca["bkv"]),
            ca["wo"], _row(ca["bo"]),
            _row(lp["ln2"]["g"]), _row(lp["ln2"]["b"]),
            lp["lin1"]["w"], _row(lp["lin1"]["b"]),
            lp["lin2"]["w"], _row(lp["lin2"]["b"]),
            _row(lp["ln3"]["g"]), _row(lp["ln3"]["b"])]


def transformer_forward(p, src, tgt, nhead):
    """Full nn.Transformer forward (batch_first) as a single pallas_call."""
    B, S, d = src.shape
    Lt = tgt.shape[1]
    args = [src, tgt]
    for lp in p["enc_layers"]:
        args += _enc_layer_args(lp)
    args += [_row(p["enc_norm"]["g"]), _row(p["enc_norm"]["b"])]
    for lp in p["dec_layers"]:
        args += _dec_layer_args(lp)
    args += [_row(p["dec_norm"]["g"]), _row(p["dec_norm"]["b"])]

    kernel = functools.partial(
        _transformer_kernel, B=B, S=S, Lt=Lt, d=d, nhead=nhead,
        n_enc=len(p["enc_layers"]), n_dec=len(p["dec_layers"]))
    return pl.pallas_call(
        kernel,
        out_shape=jax.ShapeDtypeStruct((B, Lt, d), jnp.float32),
        grid=(1,),
        in_specs=[_full_spec(a.shape) for a in args],
        out_specs=_full_spec((B, Lt, d)),
        compiler_params=_ARB1,
    )(*args)


# ------------------------------- VQ kernel ----------------------------------
# Fused: nearest-codebook argmin + one-hot + codebook gather (onehot @ codebook).

def _vq_kernel(z_ref, cb_ref, idx_ref, oh_ref, zq_ref):
    z = z_ref[...].astype(jnp.float32)      # (M, D)
    cb = cb_ref[...].astype(jnp.float32)    # (E, D)
    E = cb.shape[0]
    # Squared L2 distance; the per-row ||z||^2 term is constant per row and is
    # dropped (argmin-invariant) per the perf review.
    cc = jnp.sum(cb * cb, axis=-1)[None, :]                            # (1, E)
    zc = jax.lax.dot_general(z, cb, (((1,), (1,)), ((), ())),
                             preferred_element_type=jnp.float32)        # (M, E)
    d2 = cc - 2.0 * zc
    dmin = jnp.min(d2, axis=-1, keepdims=True)
    lane = jax.lax.broadcasted_iota(jnp.int32, d2.shape, 1)
    idx = jnp.min(jnp.where(d2 <= dmin, lane, E), axis=-1, keepdims=True)  # (M, 1)
    idx = jnp.minimum(idx, E - 1)             # guard (only reachable on NaN rows)
    onehot = (lane == idx).astype(jnp.float32)                             # (M, E)
    idx_ref[...] = idx.astype(jnp.int32)
    oh_ref[...] = onehot
    zq_ref[...] = jnp.dot(onehot, cb, preferred_element_type=jnp.float32
                          ).astype(zq_ref.dtype)


def vq_forward(z, codebook):
    """z: (B, L, D), codebook: (E, D) -> (indices (B,L), onehots (B,L,E), z_q (B,L,D))."""
    B, L, D = z.shape
    M = B * L
    E = codebook.shape[0]
    idx, onehot, zq = pl.pallas_call(
        _vq_kernel,
        out_shape=(jax.ShapeDtypeStruct((M, 1), jnp.int32),
                   jax.ShapeDtypeStruct((M, E), jnp.float32),
                   jax.ShapeDtypeStruct((M, D), jnp.float32)),
        grid=(1,),
        in_specs=[_full_spec((M, D)), _full_spec((E, D))],
        out_specs=(_full_spec((M, 1)), _full_spec((M, E)), _full_spec((M, D))),
        compiler_params=_ARB1,
    )(z.reshape(M, D), codebook)
    return idx.reshape(B, L), onehot.reshape(B, L, E), zq.reshape(B, L, D)


# ------------------------- parameter initialization --------------------------

def _uniform(key, shape, lim):
    return jax.random.uniform(key, shape, jnp.float32, -lim, lim)


def init_linear_params(key, d_in, d_out):
    kw, kb = jax.random.split(key)
    lim = 1.0 / (d_in ** 0.5)
    return {"w": _uniform(kw, (d_in, d_out), lim), "b": _uniform(kb, (d_out,), lim)}


def init_ln_params(dim):
    return {"g": jnp.ones((dim,), jnp.float32), "b": jnp.zeros((dim,), jnp.float32)}


def init_self_mha_params(key, d):
    k1, k2 = jax.random.split(key)
    lim = 1.0 / (d ** 0.5)
    return {"wqkv": _uniform(k1, (d, 3 * d), lim), "bqkv": jnp.zeros((3 * d,), jnp.float32),
            "wo": _uniform(k2, (d, d), lim), "bo": jnp.zeros((d,), jnp.float32)}


def init_cross_mha_params(key, d):
    k1, k2, k3 = jax.random.split(key, 3)
    lim = 1.0 / (d ** 0.5)
    return {"wq": _uniform(k1, (d, d), lim), "bq": jnp.zeros((d,), jnp.float32),
            "wkv": _uniform(k2, (d, 2 * d), lim), "bkv": jnp.zeros((2 * d,), jnp.float32),
            "wo": _uniform(k3, (d, d), lim), "bo": jnp.zeros((d,), jnp.float32)}


def init_encoder_layer(key, d, dff):
    ks = jax.random.split(key, 3)
    return {"attn": init_self_mha_params(ks[0], d),
            "ln1": init_ln_params(d),
            "lin1": init_linear_params(ks[1], d, dff),
            "lin2": init_linear_params(ks[2], dff, d),
            "ln2": init_ln_params(d)}


def init_decoder_layer(key, d, dff):
    ks = jax.random.split(key, 4)
    return {"self_attn": init_self_mha_params(ks[0], d),
            "cross_attn": init_cross_mha_params(ks[1], d),
            "ln1": init_ln_params(d),
            "ln2": init_ln_params(d),
            "lin1": init_linear_params(ks[2], d, dff),
            "lin2": init_linear_params(ks[3], dff, d),
            "ln3": init_ln_params(d)}


def init_transformer(key, d, n_enc, n_dec, dff):
    keys = jax.random.split(key, n_enc + n_dec)
    return {"enc_layers": [init_encoder_layer(keys[i], d, dff) for i in range(n_enc)],
            "enc_norm": init_ln_params(d),
            "dec_layers": [init_decoder_layer(keys[n_enc + i], d, dff) for i in range(n_dec)],
            "dec_norm": init_ln_params(d)}


def init_mlp(key, d_in, d_hidden, d_out):
    k1, k2 = jax.random.split(key)
    return {"l1": init_linear_params(k1, d_in, d_hidden), "ln1": init_ln_params(d_hidden),
            "l2": init_linear_params(k2, d_hidden, d_out), "ln2": init_ln_params(d_out)}


def init_vqvae(key, cfg):
    ks = jax.random.split(key, 7)
    d = cfg["codebook_dim"]
    tf = cfg["transformer"]
    return {
        "input_state": jax.random.normal(ks[0], (cfg["codebook_sequence_length"], d), jnp.float32),
        "output_state": jax.random.normal(ks[1], (cfg["output_sequence_length"], d), jnp.float32),
        "codebook": jax.random.normal(ks[2], (cfg["num_codebook_entries"], d), jnp.float32),
        "encoder": init_mlp(ks[3], cfg["input_dim"], (cfg["input_dim"] + d) // 2, d),
        "decoder": init_mlp(ks[4], d, (cfg["output_dim"] + d) // 2, cfg["output_dim"]),
        "tf_encoder": init_transformer(ks[5], d, tf["num_encoder_layers"],
                                       tf["num_decoder_layers"], tf["dim_feedforward"]),
        "tf_decoder": init_transformer(ks[6], d, tf["num_encoder_layers"],
                                       tf["num_decoder_layers"], tf["dim_feedforward"]),
    }


# ------------------------------ forward pass ---------------------------------

def vqvae_forward(params, cfg, x):
    B = x.shape[0]
    nhead = cfg["transformer"]["nhead"]

    x_enc = mlp_forward(params["encoder"], x)                          # (B, S, d)
    tgt_in = jnp.broadcast_to(params["input_state"][None],
                              (B,) + params["input_state"].shape)      # (B, Lcb, d)
    z = transformer_forward(params["tf_encoder"], x_enc, tgt_in, nhead)

    idx, onehots, z_q = vq_forward(z, params["codebook"])

    # `if self.train:` in the reference is always truthy (bound method) -> always computed.
    tgt_out = jnp.broadcast_to(params["output_state"][None],
                               (B,) + params["output_state"].shape)
    rec = transformer_forward(params["tf_decoder"], z_q, tgt_out, nhead)
    rec = mlp_forward(params["decoder"], rec)

    return {"z": z, "discrete_z": z_q, "codebook_indecies": idx,
            "codebook_onehots": onehots, "reconstruction": rec}


# ----------------------------------- main ------------------------------------

if __name__ == "__main__":
    cfg = {
        "input_dim": 16,
        "codebook_dim": 32,
        "num_codebook_entries": 64,
        "output_dim": 16,
        "codebook_sequence_length": 8,
        "output_sequence_length": 8,
        # nn.Transformer kwargs (dropout=0.0 -> deterministic / eval-equivalent)
        "transformer": {"nhead": 4, "num_encoder_layers": 1, "num_decoder_layers": 1,
                        "dim_feedforward": 64, "dropout": 0.0},
    }
    key = jax.random.PRNGKey(0)
    kp, kx = jax.random.split(key)
    params = init_vqvae(kp, cfg)

    B, S = 2, 8
    x = jax.random.normal(kx, (B, S, cfg["input_dim"]), jnp.float32)

    out = vqvae_forward(params, cfg, x)
    out = jax.block_until_ready(out)

    assert out["z"].shape == (B, cfg["codebook_sequence_length"], cfg["codebook_dim"])
    assert out["discrete_z"].shape == (B, cfg["codebook_sequence_length"], cfg["codebook_dim"])
    assert out["codebook_indecies"].shape == (B, cfg["codebook_sequence_length"])
    assert out["codebook_onehots"].shape == (B, cfg["codebook_sequence_length"],
                                             cfg["num_codebook_entries"])
    assert out["reconstruction"].shape == (B, cfg["output_sequence_length"], cfg["output_dim"])
    assert bool(jnp.all(jnp.isfinite(out["z"])))
    assert bool(jnp.all(jnp.isfinite(out["reconstruction"])))
    print("KERNEL_OK")
</pallas_src>

<mosaic_0001>
module attributes {stable_mosaic.version = 11 : i64} {
  func.func @_mlp_kernel(%arg0: i32, %arg1: memref<2x8x16xf32, #tpu.memory_space<vmem>>, %arg2: memref<16x24xf32, #tpu.memory_space<vmem>>, %arg3: memref<1x24xf32, #tpu.memory_space<vmem>>, %arg4: memref<1x24xf32, #tpu.memory_space<vmem>>, %arg5: memref<1x24xf32, #tpu.memory_space<vmem>>, %arg6: memref<24x32xf32, #tpu.memory_space<vmem>>, %arg7: memref<1x32xf32, #tpu.memory_space<vmem>>, %arg8: memref<1x32xf32, #tpu.memory_space<vmem>>, %arg9: memref<1x32xf32, #tpu.memory_space<vmem>>, %arg10: memref<2x8x32xf32, #tpu.memory_space<vmem>>) attributes {dimension_semantics = [#tpu.dimension_semantics<arbitrary>], iteration_bounds = array<i64: 1>, scalar_prefetch = 0 : i64, scratch_operands = 0 : i64, tpu.core_type = #tpu.core_type<tc>, window_params = [{pipeline_mode = #tpu.pipeline_mode<synchronous>, transform_indices = @transform_0, window_bounds = array<i64: 2, 8, 16>}, {pipeline_mode = #tpu.pipeline_mode<synchronous>, transform_indices = @transform_1, window_bounds = array<i64: 16, 24>}, {pipeline_mode = #tpu.pipeline_mode<synchronous>, transform_indices = @transform_2, window_bounds = array<i64: 1, 24>}, {pipeline_mode = #tpu.pipeline_mode<synchronous>, transform_indices = @transform_3, window_bounds = array<i64: 1, 24>}, {pipeline_mode = #tpu.pipeline_mode<synchronous>, transform_indices = @transform_4, window_bounds = array<i64: 1, 24>}, {pipeline_mode = #tpu.pipeline_mode<synchronous>, transform_indices = @transform_5, window_bounds = array<i64: 24, 32>}, {pipeline_mode = #tpu.pipeline_mode<synchronous>, transform_indices = @transform_6, window_bounds = array<i64: 1, 32>}, {pipeline_mode = #tpu.pipeline_mode<synchronous>, transform_indices = @transform_7, window_bounds = array<i64: 1, 32>}, {pipeline_mode = #tpu.pipeline_mode<synchronous>, transform_indices = @transform_8, window_bounds = array<i64: 1, 32>}, {pipeline_mode = #tpu.pipeline_mode<synchronous>, transform_indices = @transform_9, window_bounds = array<i64: 2, 8, 32>}]} {
    %c0 = arith.constant 0 : index
    %c0_0 = arith.constant 0 : index
    %c0_1 = arith.constant 0 : index
    %0 = vector.load %arg1[%c0, %c0_0, %c0_1] : memref<2x8x16xf32, #tpu.memory_space<vmem>>, vector<2x8x16xf32>
    %1 = vector.shape_cast %0 : vector<2x8x16xf32> to vector<16x16xf32>
    %c0_2 = arith.constant 0 : index
    %c0_3 = arith.constant 0 : index
    %2 = vector.load %arg2[%c0_2, %c0_3] : memref<16x24xf32, #tpu.memory_space<vmem>>, vector<16x24xf32>
    %cst = arith.constant dense<0.000000e+00> : vector<16x24xf32>
    %3 = tpu.matmul %1, %2, %cst {dimension_numbers = #tpu.dot_dimension_numbers<[1], [0], [0], [1], [0, 0, 1, 1], [], []>} : vector<16x16xf32>, vector<16x24xf32>, vector<16x24xf32> -> vector<16x24xf32>
    %c0_4 = arith.constant 0 : index
    %c0_5 = arith.constant 0 : index
    %4 = vector.load %arg3[%c0_4, %c0_5] : memref<1x24xf32, #tpu.memory_space<vmem>>, vector<1x24xf32>
    %5 = vector.broadcast %4 : vector<1x24xf32> to vector<16x24xf32>
    %6 = arith.addf %3, %5 : vector<16x24xf32>
    %c0_6 = arith.constant 0 : index
    %c0_7 = arith.constant 0 : index
    %7 = vector.load %arg4[%c0_6, %c0_7] : memref<1x24xf32, #tpu.memory_space<vmem>>, vector<1x24xf32>
    %c0_8 = arith.constant 0 : index
    %c0_9 = arith.constant 0 : index
    %8 = vector.load %arg5[%c0_8, %c0_9] : memref<1x24xf32, #tpu.memory_space<vmem>>, vector<1x24xf32>
    %cst_10 = arith.constant dense<0.000000e+00> : vector<16xf32>
    %9 = vector.multi_reduction <add>, %6, %cst_10 [1] : vector<16x24xf32> to vector<16xf32>
    %10 = vector.shape_cast %9 : vector<16xf32> to vector<16x1xf32>
    %cst_11 = arith.constant 2.400000e+01 : f32
    %11 = vector.broadcast %cst_11 : f32 to vector<16x1xf32>
    %12 = arith.divf %10, %11 : vector<16x1xf32>
    %13 = vector.broadcast %12 : vector<16x1xf32> to vector<16x24xf32>
    %14 = arith.subf %6, %13 : vector<16x24xf32>
    %15 = arith.mulf %14, %14 : vector<16x24xf32>
    %cst_12 = arith.constant dense<0.000000e+00> : vector<16xf32>
    %16 = vector.multi_reduction <add>, %15, %cst_12 [1] : vector<16x24xf32> to vector<16xf32>
    %17 = vector.shape_cast %16 : vector<16xf32> to vector<16x1xf32>
    %cst_13 = arith.constant 2.400000e+01 : f32
    %18 = vector.broadcast %cst_13 : f32 to vector<16x1xf32>
    %19 = arith.divf %17, %18 : vector<16x1xf32>
    %20 = vector.broadcast %12 : vector<16x1xf32> to vector<16x24xf32>
    %21 = arith.subf %6, %20 : vector<16x24xf32>
    %cst_14 = arith.constant 9.99999974E-6 : f32
    %22 = vector.broadcast %cst_14 : f32 to vector<16x1xf32>
    %23 = arith.addf %19, %22 : vector<16x1xf32>
    %24 = math.rsqrt %23 : vector<16x1xf32>
    %25 = vector.broadcast %24 : vector<16x1xf32> to vector<16x24xf32>
    %26 = arith.mulf %21, %25 : vector<16x24xf32>
    %27 = vector.broadcast %7 : vector<1x24xf32> to vector<16x24xf32>
    %28 = arith.mulf %26, %27 : vector<16x24xf32>
    %29 = vector.broadcast %8 : vector<1x24xf32> to vector<16x24xf32>
    %30 = arith.addf %28, %29 : vector<16x24xf32>
    %31 = arith.negf %30 : vector<16x24xf32>
    %32 = math.exp %31 : vector<16x24xf32>
    %cst_15 = arith.constant 1.000000e+00 : f32
    %33 = vector.broadcast %cst_15 : f32 to vector<16x24xf32>
    %34 = arith.addf %33, %32 : vector<16x24xf32>
    %35 = arith.divf %33, %34 : vector<16x24xf32>
    %36 = arith.mulf %30, %35 : vector<16x24xf32>
    %c0_16 = arith.constant 0 : index
    %c0_17 = arith.constant 0 : index
    %37 = vector.load %arg6[%c0_16, %c0_17] : memref<24x32xf32, #tpu.memory_space<vmem>>, vector<24x32xf32>
    %cst_18 = arith.constant dense<0.000000e+00> : vector<16x32xf32>
    %38 = tpu.matmul %36, %37, %cst_18 {dimension_numbers = #tpu.dot_dimension_numbers<[1], [0], [0], [1], [0, 0, 1, 1], [], []>} : vector<16x24xf32>, vector<24x32xf32>, vector<16x32xf32> -> vector<16x32xf32>
    %c0_19 = arith.constant 0 : index
    %c0_20 = arith.constant 0 : index
    %39 = vector.load %arg7[%c0_19, %c0_20] : memref<1x32xf32, #tpu.memory_space<vmem>>, vector<1x32xf32>
    %40 = vector.broadcast %39 : vector<1x32xf32> to vector<16x32xf32>
    %41 = arith.addf %38, %40 : vector<16x32xf32>
    %c0_21 = arith.constant 0 : index
    %c0_22 = arith.constant 0 : index
    %42 = vector.load %arg8[%c0_21, %c0_22] : memref<1x32xf32, #tpu.memory_space<vmem>>, vector<1x32xf32>
    %c0_23 = arith.constant 0 : index
    %c0_24 = arith.constant 0 : index
    %43 = vector.load %arg9[%c0_23, %c0_24] : memref<1x32xf32, #tpu.memory_space<vmem>>, vector<1x32xf32>
    %cst_25 = arith.constant dense<0.000000e+00> : vector<16xf32>
    %44 = vector.multi_reduction <add>, %41, %cst_25 [1] : vector<16x32xf32> to vector<16xf32>
    %45 = vector.shape_cast %44 : vector<16xf32> to vector<16x1xf32>
    %cst_26 = arith.constant 3.200000e+01 : f32
    %46 = vector.broadcast %cst_26 : f32 to vector<16x1xf32>
    %47 = arith.divf %45, %46 : vector<16x1xf32>
    %48 = vector.broadcast %47 : vector<16x1xf32> to vector<16x32xf32>
    %49 = arith.subf %41, %48 : vector<16x32xf32>
    %50 = arith.mulf %49, %49 : vector<16x32xf32>
    %cst_27 = arith.constant dense<0.000000e+00> : vector<16xf32>
    %51 = vector.multi_reduction <add>, %50, %cst_27 [1] : vector<16x32xf32> to vector<16xf32>
    %52 = vector.shape_cast %51 : vector<16xf32> to vector<16x1xf32>
    %cst_28 = arith.constant 3.200000e+01 : f32
    %53 = vector.broadcast %cst_28 : f32 to vector<16x1xf32>
    %54 = arith.divf %52, %53 : vector<16x1xf32>
    %55 = vector.broadcast %47 : vector<16x1xf32> to vector<16x32xf32>
    %56 = arith.subf %41, %55 : vector<16x32xf32>
    %cst_29 = arith.constant 9.99999974E-6 : f32
    %57 = vector.broadcast %cst_29 : f32 to vector<16x1xf32>
    %58 = arith.addf %54, %57 : vector<16x1xf32>
    %59 = math.rsqrt %58 : vector<16x1xf32>
    %60 = vector.broadcast %59 : vector<16x1xf32> to vector<16x32xf32>
    %61 = arith.mulf %56, %60 : vector<16x32xf32>
    %62 = vector.broadcast %42 : vector<1x32xf32> to vector<16x32xf32>
    %63 = arith.mulf %61, %62 : vector<16x32xf32>
    %64 = vector.broadcast %43 : vector<1x32xf32> to vector<16x32xf32>
    %65 = arith.addf %63, %64 : vector<16x32xf32>
    %66 = arith.negf %65 : vector<16x32xf32>
    %67 = math.exp %66 : vector<16x32xf32>
    %cst_30 = arith.constant 1.000000e+00 : f32
    %68 = vector.broadcast %cst_30 : f32 to vector<16x32xf32>
    %69 = arith.addf %68, %67 : vector<16x32xf32>
    %70 = arith.divf %68, %69 : vector<16x32xf32>
    %71 = arith.mulf %65, %70 : vector<16x32xf32>
    %72 = vector.shape_cast %71 : vector<16x32xf32> to vector<2x8x32xf32>
    %c0_31 = arith.constant 0 : index
    %c0_32 = arith.constant 0 : index
    %c0_33 = arith.constant 0 : index
    %73 = vector.load %arg10[%c0_31, %c0_32, %c0_33] : memref<2x8x32xf32, #tpu.memory_space<vmem>>, vector<2x8x32xf32>
    tpu.vector_store %arg10[%c0_31, %c0_32, %c0_33], %72 {strides = array<i32>} : memref<2x8x32xf32, #tpu.memory_space<vmem>>, vector<2x8x32xf32>,
    return
  }
  func.func @transform_0(%arg0: i32) -> (i32, i32, i32) {
    %c0_i32 = arith.constant 0 : i32
    %c0_i32_0 = arith.constant 0 : i32
    %c0_i32_1 = arith.constant 0 : i32
    %c0_i32_2 = arith.constant 0 : i32
    return %c0_i32, %c0_i32_0, %c0_i32_1 : i32, i32, i32
  }
  func.func @transform_1(%arg0: i32) -> (i32, i32) {
    %c0_i32 = arith.constant 0 : i32
    %c0_i32_0 = arith.constant 0 : i32
    %c0_i32_1 = arith.constant 0 : i32
    return %c0_i32, %c0_i32_0 : i32, i32
  }
  func.func @transform_2(%arg0: i32) -> (i32, i32) {
    %c0_i32 = arith.constant 0 : i32
    %c0_i32_0 = arith.constant 0 : i32
    %c0_i32_1 = arith.constant 0 : i32
    return %c0_i32, %c0_i32_0 : i32, i32
  }
  func.func @transform_3(%arg0: i32) -> (i32, i32) {
    %c0_i32 = arith.constant 0 : i32
    %c0_i32_0 = arith.constant 0 : i32
    %c0_i32_1 = arith.constant 0 : i32
    return %c0_i32, %c0_i32_0 : i32, i32
  }
  func.func @transform_4(%arg0: i32) -> (i32, i32) {
    %c0_i32 = arith.constant 0 : i32
    %c0_i32_0 = arith.constant 0 : i32
    %c0_i32_1 = arith.constant 0 : i32
    return %c0_i32, %c0_i32_0 : i32, i32
  }
  func.func @transform_5(%arg0: i32) -> (i32, i32) {
    %c0_i32 = arith.constant 0 : i32
    %c0_i32_0 = arith.constant 0 : i32
    %c0_i32_1 = arith.constant 0 : i32
    return %c0_i32, %c0_i32_0 : i32, i32
  }
  func.func @transform_6(%arg0: i32) -> (i32, i32) {
    %c0_i32 = arith.constant 0 : i32
    %c0_i32_0 = arith.constant 0 : i32
    %c0_i32_1 = arith.constant 0 : i32
    return %c0_i32, %c0_i32_0 : i32, i32
  }
  func.func @transform_7(%arg0: i32) -> (i32, i32) {
    %c0_i32 = arith.constant 0 : i32
    %c0_i32_0 = arith.constant 0 : i32
    %c0_i32_1 = arith.constant 0 : i32
    return %c0_i32, %c0_i32_0 : i32, i32
  }
  func.func @transform_8(%arg0: i32) -> (i32, i32) {
    %c0_i32 = arith.constant 0 : i32
    %c0_i32_0 = arith.constant 0 : i32
    %c0_i32_1 = arith.constant 0 : i32
    return %c0_i32, %c0_i32_0 : i32, i32
  }
  func.func @transform_9(%arg0: i32) -> (i32, i32, i32) {
    %c0_i32 = arith.constant 0 : i32
    %c0_i32_0 = arith.constant 0 : i32
    %c0_i32_1 = arith.constant 0 : i32
    %c0_i32_2 = arith.constant 0 : i32
    return %c0_i32, %c0_i32_0, %c0_i32_1 : i32, i32, i32
  }
}

</mosaic_0001>

<bundles_post_ra>
// kernel: tpu_custom_call.1
= control target key start
LH: loop header
LB: loop body
LE: loop exit
PB: predicated region body
PF: predicated region fallthrough
CT: control target
= control target key end

     0   :  { %14 = vsyncpa [#allocation3], 0  ;;  %s663_s0 = inlined_call_operand.hbm [shape: f32[2,8,16], index: 0, kind: input, shape index: {}]   ;;  %s664_s1 = inlined_call_operand.hbm [shape: f32[16,24], index: 1, kind: input, shape index: {}]   ;;  %s665_s2 = inlined_call_operand.vmem [shape: f32[1,24], index: 2, kind: input, shape index: {}]   ;;  %s666_s3 = inlined_call_operand.vmem [shape: f32[1,24], index: 3, kind: input, shape index: {}]   ;;  %s667_s4 = inlined_call_operand.vmem [shape: f32[1,24], index: 4, kind: input, shape index: {}]   ;;  %s668_s5 = inlined_call_operand.hbm [shape: f32[24,32], index: 5, kind: input, shape index: {}]   ;;  %s669_s6 = inlined_call_operand.vmem [shape: f32[1,32], index: 6, kind: input, shape index: {}]   ;;  %s670_s7 = inlined_call_operand.vmem [shape: f32[1,32], index: 7, kind: input, shape index: {}]   ;;  %s671_s8 = inlined_call_operand.vmem [shape: f32[1,32], index: 8, kind: input, shape index: {}]   ;;  %s672_s9 = inlined_call_operand.hbm [shape: f32[2,8,32], index: 9, kind: output, shape index: {}]  }
   0x1   :  { %15 = vsyncpa [#allocation6], 0 }
   0x2   :  { %16 = vsyncpa [#allocation4], 0  ;;  %s553_s30 = smov [#allocation5]   ;;  %s554_s11 = smov [#allocation2]  }
   0x3   :  { %s34_s10 = sshll.u32 %s553_s30, 4  ;;  %s22_s12 = sshll.u32 %s554_s11, 4  ;;  %s35_s10 = int_to_ptr.vmem [resolvable:$true] %s34_s10  ;;  %s23_s12 = int_to_ptr.vmem [resolvable:$true] %s22_s12 }
   0x4   :  { %s475_s13 = scalar_lea.vmem %s35_s10, 256  ;;  %p480_p1 = scmp.lt.s32.totalorder %s35_s10, %s35_s10 }
   0x5   :  { %p476_p0 = scmp.ne.s32.totalorder %s35_s10, %s475_s13  ;;  %p481_p2 = scmp.lt.s32.totalorder %s475_s13, %s475_s13 }
   0x7   :  { %p482_p3 = por %p481_p2, %p480_p1 }
   0x9   :  { %p483_p4 = pnand %p482_p3, %p476_p0 }
   0xb   :  { %486 = shalt.err (!%p483_p4)
}
   0xc   :  { %s555_s14 = smov 128   ;;  %s556_s15 = smov 8  }
   0xd   :  { %40 = dma.hbm_to_vmem [thread:$0]  %s664_s1, 256, %s35_s10, [#allocation6], %s555_s14, %s555_s14, %s556_s15  }
   0xe   :  { %s495_s18 = scalar_lea.vmem %s23_s12, 256  ;;  %p500_p6 = scmp.lt.s32.totalorder %s23_s12, %s23_s12 }
   0xf   :  { %p496_p5 = scmp.ne.s32.totalorder %s23_s12, %s495_s18  ;;  %p501_p7 = scmp.lt.s32.totalorder %s495_s18, %s495_s18 }
  0x11   :  { %p502_p8 = por %p501_p7, %p500_p6 }
  0x13   :  { %p503_p9 = pnand %p502_p8, %p496_p5 }
  0x15   :  { %506 = shalt.err (!%p503_p9)
}
  0x16   :  { %28 = dma.hbm_to_vmem [thread:$0]  %s663_s0, 256, %s23_s12, [#allocation3], %s555_s14, %s555_s14, %s556_s15  }
  0x17   :  { %s557_s21 = smov [#allocation7]  }
  0x18   :  { %s52_s22 = sshll.u32 %s557_s21, 4  ;;  %s53_s22 = int_to_ptr.vmem [resolvable:$true] %s52_s22 }
  0x19   :  { %s515_s23 = scalar_lea.vmem %s53_s22, 384  ;;  %p520_p11 = scmp.lt.s32.totalorder %s53_s22, %s53_s22 }
  0x1a   :  { %p516_p10 = scmp.ne.s32.totalorder %s53_s22, %s515_s23  ;;  %p521_p12 = scmp.lt.s32.totalorder %s515_s23, %s515_s23 }
  0x1c   :  { %p522_p13 = por %p521_p12, %p520_p11 }
  0x1e   :  { %p523_p0 = pnand %p522_p13, %p516_p10 }
  0x20   :  { %526 = shalt.err (!%p523_p0)
}
  0x21   :  { %58 = dma.hbm_to_vmem [thread:$0]  %s668_s5, 384, %s53_s22, [#allocation6], %s555_s14, %s555_s14, %s556_s15  }
  0x22   :  { %547 = dma.done.wait [#allocation3], 256  }
  0x23   :  { %548 = vsyncadd [#allocation3], 4294967040 }
  0x24   :  { %549 = dma.done.wait [#allocation6], 640  }
  0x25   :  { %550 = vsyncadd [#allocation6], 4294966656  ;;  %vm85_vm0 = vcmask 130048   ;;  %v77_v0 = vld [vmem:[#allocation5 + $0x8] sm:$0xff]  ;;  %v76_v1 = vld [vmem:[#allocation5] sm:$0xff]  ;;  %vm169_vm1 = vcmask 195584  }
  0x26   :  { %v74_v2 = vld [vmem:[#allocation2] sm:$0xff]  ;;  %421 = vmatprep.subr.mxu0 %v77_v0  ;;  %v75_v3 = vld [vmem:[#allocation2 + $0x8] sm:$0xff]  ;;  %v229_v21 = vld [vmem:[#allocation7 + $0x10] sm:$0xff]  ;;  %vm320_vm2 = vcmask 261120  }
  0x27   :  { %425 = vmatprep.mubr.msk.f32.mxu0 %vm85_vm0, %v74_v2  ;;  %422 = vmatpush3.msra.mxu0 %v77_v0  ;;  %v398_v5 = vld [vmem:[%s665_s2] ss:$0 sm:$0xff]  ;;  %v228_v22 = vld [vmem:[#allocation7 + $0x8] sm:$0xff] }
  0x28   :  { %423 = vmatprep.subr.mxu0 %v76_v1  ;;  %428 = vmatprep.subr.mxu1 %v229_v21  ;;  %v227_v23 = vld [vmem:[#allocation7] sm:$0xff] }
  0x29   :  { %424 = vmatpush3.msra.mxu0 %v76_v1  ;;  %429 = vmatpush3.msra.mxu1 %v229_v21  ;;  %v401_v31 = vld [vmem:[%s666_s3] ss:$0 sm:$0xff] }
  0x2a   :  { %426 = vmatmul.mubr.msk.f32.vlgmr.msra.gmra.mxu0 %vm85_vm0, %v75_v3  ;;  %430 = vmatprep.subr.mxu1 %v228_v22  ;;  %v402_v33 = vld [vmem:[%s667_s4] ss:$0 sm:$0xff] }
  0x2b   :  { %431 = vmatpush3.msra.mxu1 %v228_v22  ;;  %v405_v50 = vld [vmem:[%s669_s6] ss:$0 sm:$0xff] }
  0x2c   :  { %432 = vmatprep.subr.mxu1 %v227_v23 }
  0x2d   :  { %433 = vmatpush3.msra.mxu1 %v227_v23 }
  0xea   :  { %v427_v4 = vpop.f32.mrf.mxu0 }
  0xeb   :  { %v164_v8 = vadd.f32 %v427_v4, %v398_v5 }
  0xec   :  { %v158_v6 = vpop.f32.mrf.mxu0 }
  0xed   :  { %v159_v7 = vadd.f32 %v398_v5, %v158_v6  ;;  %v173_v10 = vsel %vm169_vm1, %v164_v8, 0.0 }
  0xef   :  { %v170_v9 = vsel %vm169_vm1, %v159_v7, 0.0 }
  0xf0   :  { %171 = vadd.xlane.f32.xlu0 %v170_v9 }
  0xf4   :  { %174 = vadd.xlane.f32.xlu0 %v173_v10  ;;  %v408_v10 = vld [vmem:[%s670_s7] ss:$0 sm:$0xff]  ;;  %s558_s7 = smov [#allocation8]  }
  0xf5   :  { %s385_s10 = sshll.u32 %s558_s7, 4  ;;  %s386_s10 = int_to_ptr.vmem [resolvable:$true] %s385_s10 }
  0xf6   :  { %p532_p2 = scmp.lt.s32.totalorder %s386_s10, %s386_s10 }
 0x179   :  { %v172_v11 = vpop.xlane.xlu0 %171 }
 0x17a   :  { %v177_v12 = vmul.f32 0.041666668, %v172_v11 }
 0x17c   :  { %v179_v13 = vsub.f32 %v159_v7, %v177_v12 }
 0x17d   :  { %v175_v14 = vpop.xlane.xlu0 %174 }
 0x17e   :  { %v178_v15 = vmul.f32 0.041666668, %v175_v14  ;;  %v181_v16 = vmul.f32 %v179_v13, %v179_v13 }
 0x180   :  { %v180_v17 = vsub.f32 %v164_v8, %v178_v15  ;;  %v183_v18 = vsel %vm169_vm1, %v181_v16, 0.0 }
 0x181   :  { %184 = vadd.xlane.f32.xlu1 %v183_v18 }
 0x182   :  { %v182_v19 = vmul.f32 %v180_v17, %v180_v17 }
 0x184   :  { %v186_v20 = vsel %vm169_vm1, %v182_v19, 0.0 }
 0x185   :  { %187 = vadd.xlane.f32.xlu1 %v186_v20 }
 0x20a   :  { %v185_v24 = vpop.xlane.xlu1 %184 }
 0x20b   :  { %v189_v25 = vmul.f32 0.041666668, %v185_v24 }
 0x20d   :  { %v191_v26 = vadd.f32 1e-05, %v189_v25 }
 0x20e   :  { %v188_v27 = vpop.xlane.xlu1 %187 }
 0x20f   :  { %443 = vrsqrt.f32 %v191_v26  ;;  %v190_v28 = vmul.f32 0.041666668, %v188_v27 }
 0x211   :  { %v192_v29 = vadd.f32 1e-05, %v190_v28 }
 0x213   :  { %445 = vrsqrt.f32 %v192_v29 }
 0x21c   :  { %v444_v30 = vpop.eup %443 }
 0x21d   :  { %v195_v32 = vmul.f32 %v444_v30, %v179_v13  ;;  %v409_v13 = vld [vmem:[%s671_s8] ss:$0 sm:$0xff]  ;;  %s527_s8 = scalar_lea.vmem %s386_s10, 256 }
 0x21e   :  { %p528_p1 = scmp.ne.s32.totalorder %s386_s10, %s527_s8  ;;  %p533_p3 = scmp.lt.s32.totalorder %s527_s8, %s527_s8 }
 0x21f   :  { %v203_v34 = vmul.f32 %v401_v31, %v195_v32 }
 0x220   :  { %v446_v35 = vpop.eup %445  ;;  %p534_p4 = por %p533_p3, %p532_p2 }
 0x221   :  { %v196_v36 = vmul.f32 %v446_v35, %v180_v17  ;;  %v211_v37 = vadd.f32 %v402_v33, %v203_v34 }
 0x222   :  { %p535_p5 = pnand %p534_p4, %p528_p1 }
 0x223   :  { %v204_v38 = vmul.f32 %v401_v31, %v196_v36  ;;  %v403_v39 = vmul.f32 -1.442695, %v211_v37 }
 0x225   :  { %v212_v40 = vadd.f32 %v402_v33, %v204_v38  ;;  %447 = vpow2.f32 %v403_v39 }
 0x227   :  { %v404_v41 = vmul.f32 -1.442695, %v212_v40 }
 0x229   :  { %449 = vpow2.f32 %v404_v41 }
 0x232   :  { %v448_v42 = vpop.eup %447 }
 0x233   :  { %v219_v43 = vadd.f32 1.0, %v448_v42 }
 0x235   :  { %451 = vrcp.f32 %v219_v43 }
 0x236   :  { %v450_v44 = vpop.eup %449 }
 0x237   :  { %v220_v45 = vadd.f32 1.0, %v450_v44 }
 0x239   :  { %453 = vrcp.f32 %v220_v45 }
 0x242   :  { %v452_v46 = vpop.eup %451 }
 0x243   :  { %v225_v47 = vmul.f32 %v452_v46, %v211_v37 }
 0x245   :  { %434 = vmatprep.mubr.msk.f32.mxu1 %vm169_vm1, %v225_v47 }
 0x246   :  { %v454_v48 = vpop.eup %453 }
 0x247   :  { %v226_v49 = vmul.f32 %v454_v48, %v212_v40 }
 0x249   :  { %435 = vmatmul.mubr.msk.f32.vlgmr.msra.gmra.mxu1 %vm169_vm1, %v226_v49 }
 0x309   :  { %v436_v51 = vpop.f32.mrf.mxu1 }
 0x30a   :  { %v315_v52 = vadd.f32 %v436_v51, %v405_v50 }
 0x30b   :  { %v309_v53 = vpop.f32.mrf.mxu1 }
 0x30c   :  { %v310_v54 = vadd.f32 %v405_v50, %v309_v53  ;;  %v324_v55 = vsel %vm320_vm2, %v315_v52, 0.0 }
 0x30d   :  { %325 = vadd.xlane.f32.xlu1 %v324_v55 }
 0x30e   :  { %v321_v56 = vsel %vm320_vm2, %v310_v54, 0.0 }
 0x30f   :  { %322 = vadd.xlane.f32.xlu0 %v321_v56 }
 0x396   :  { %v326_v57 = vpop.xlane.xlu1 %325 }
 0x397   :  { %v329_v58 = vmul.f32 0.03125, %v326_v57 }
 0x398   :  { %v323_v59 = vpop.xlane.xlu0 %322 }
 0x399   :  { %v331_v60 = vsub.f32 %v315_v52, %v329_v58  ;;  %v328_v61 = vmul.f32 0.03125, %v323_v59 }
 0x39b   :  { %v330_v62 = vsub.f32 %v310_v54, %v328_v61  ;;  %v333_v63 = vmul.f32 %v331_v60, %v331_v60 }
 0x39d   :  { %v337_v0 = vsel %vm320_vm2, %v333_v63, 0.0  ;;  %v332_v1 = vmul.f32 %v330_v62, %v330_v62 }
 0x39e   :  { %338 = vadd.xlane.f32.xlu1 %v337_v0 }
 0x39f   :  { %v334_v2 = vsel %vm320_vm2, %v332_v1, 0.0 }
 0x3a0   :  { %335 = vadd.xlane.f32.xlu0 %v334_v2 }
 0x427   :  { %v339_v3 = vpop.xlane.xlu1 %338 }
 0x428   :  { %v341_v4 = vmul.f32 0.03125, %v339_v3 }
 0x429   :  { %v336_v5 = vpop.xlane.xlu0 %335 }
 0x42a   :  { %v343_v6 = vadd.f32 1e-05, %v341_v4  ;;  %v340_v7 = vmul.f32 0.03125, %v336_v5 }
 0x42c   :  { %455 = vrsqrt.f32 %v343_v6  ;;  %v342_v8 = vadd.f32 1e-05, %v340_v7 }
 0x42e   :  { %457 = vrsqrt.f32 %v342_v8 }
 0x439   :  { %v456_v9 = vpop.eup %455 }
 0x43a   :  { %v347_v11 = vmul.f32 %v456_v9, %v331_v60 }
 0x43b   :  { %v458_v12 = vpop.eup %457 }
 0x43c   :  { %v346_v14 = vmul.f32 %v458_v12, %v330_v62  ;;  %v355_v15 = vmul.f32 %v408_v10, %v347_v11 }
 0x43e   :  { %v354_v16 = vmul.f32 %v408_v10, %v346_v14  ;;  %v363_v17 = vadd.f32 %v409_v13, %v355_v15 }
 0x440   :  { %v362_v18 = vadd.f32 %v409_v13, %v354_v16  ;;  %v411_v19 = vmul.f32 -1.442695, %v363_v17 }
 0x442   :  { %v410_v20 = vmul.f32 -1.442695, %v362_v18  ;;  %459 = vpow2.f32 %v411_v19 }
 0x444   :  { %461 = vpow2.f32 %v410_v20 }
 0x44f   :  { %v460_v21 = vpop.eup %459 }
 0x450   :  { %v371_v22 = vadd.f32 1.0, %v460_v21 }
 0x451   :  { %v462_v23 = vpop.eup %461 }
 0x452   :  { %v370_v24 = vadd.f32 1.0, %v462_v23  ;;  %463 = vrcp.f32 %v371_v22 }
 0x454   :  { %465 = vrcp.f32 %v370_v24 }
 0x45f   :  { %v464_v25 = vpop.eup %463 }
 0x460   :  { %v377_v26 = vmul.f32 %v464_v25, %v363_v17 }
 0x461   :  { %v466_v27 = vpop.eup %465 }
 0x462   :  { %v376_v28 = vmul.f32 %v466_v27, %v362_v18  ;;  %379 = vst.msk [vmem:[#allocation8 + $0x8] sm:$0xff] %vm320_vm2, %v377_v26 }
 0x464   :  { %378 = vst.msk [vmem:[#allocation8] sm:$0xff] %vm320_vm2, %v376_v28 }
 0x465   :  { %538 = shalt.err (!%p535_p5)
}
 0x466   :  { %391 = dma.vmem_to_hbm [thread:$0]  %s386_s10, 256, %s672_s9, [#allocation4], %s555_s14, %s555_s14, %s556_s15  }
 0x467   :  { %551 = dma.done.wait [#allocation4], 256  }
 0x468   :  { %552 = vsyncadd [#allocation4], 4294967040 }
 0x469   :  { %395 = vsyncpa [#allocation3], 1 }
 0x46a   :  { %396 = vsyncpa [#allocation6], 1 }
 0x46b   :  { %397 = vsyncpa [#allocation4], 1 }

</bundles_post_ra>
